<compile_context>
chip_gen: v5e
topology: v5e:2x2
jax: 0.10.0
libtpu: 0.0.40
codegen_flags: <defaults>
</compile_context>

<pallas_src>
from functools import partial

import jax
import jax.numpy as jnp
from jax.experimental import pallas as pl
from jax.experimental.pallas import tpu as pltpu

_LANE = 128
_NEG_BIG = -1e30  # finite "-inf" for masked softmax rows (avoids inf-inf NaNs)


# ----------------------------------------------------------------------------
# helpers
# ----------------------------------------------------------------------------
def _round_up(x, m):
    return ((x + m - 1) // m) * m


def _pad_last(x, target):
    pad = target - x.shape[-1]
    if pad == 0:
        return x
    widths = [(0, 0)] * (x.ndim - 1) + [(0, pad)]
    return jnp.pad(x, widths)


def _pad_last2(x, t0, t1):
    p0 = t0 - x.shape[-2]
    p1 = t1 - x.shape[-1]
    if p0 == 0 and p1 == 0:
        return x
    widths = [(0, 0)] * (x.ndim - 2) + [(0, p0), (0, p1)]
    return jnp.pad(x, widths)


def _vmem_capacity_bytes():
    """Generation-aware VMEM capacity; conservative (v7x, 64 MiB) fallback."""
    try:
        return int(pltpu.get_tpu_info().vmem_capacity_bytes)
    except Exception:
        return 64 << 20


def _vmem_limit_bytes(block_bytes, cap):
    # pipelined input buffers + resident blocks + headroom, capped below physical.
    est = 3 * block_bytes + (8 << 20)
    hi = max(int(cap * 3 // 4), 16 << 20)
    return int(min(max(est, 16 << 20), hi))


def _pick_div(n, cands):
    """Largest candidate dividing n (n is always a multiple of 128 here)."""
    for t in cands:
        if n % t == 0:
            return t
    return n


def _pick_tiles(n_pad, cap):
    """dst tile tm (>=2 tiles for megacore) and src tile tk, VMEM-generation aware."""
    big = cap >= (96 << 20)  # v5e/v6e: 128 MiB physical; v7x: 64 MiB
    tm_cands = (512, 256, 128, 64) if big else (256, 128, 64)
    tk_cands = (2048, 1024, 512, 256, 128) if big else (1024, 512, 256, 128)
    tm = next(t for t in tm_cands if n_pad % t == 0 and n_pad // t >= 2)
    tk = next(t for t in tk_cands if n_pad % t == 0)
    return tm, tk


# ----------------------------------------------------------------------------
# Pallas kernel 1: per-relation feature transform  XW[r] = X @ W_r.
# Grid: (n_node_tiles, R); the X tile stays resident across the inner r axis.
# ----------------------------------------------------------------------------
def _xw_kernel(x_ref, w_ref, o_ref):
    o_ref[0] = jnp.dot(x_ref[...], w_ref[0], preferred_element_type=jnp.float32)


def xw_transform(x, weight, *, cap):
    """x: (N_pad, f_in), weight: (R, f_in, f_out) -> (R, N_pad, f_out)."""
    n_pad, f_in = x.shape
    R, _, f_out = weight.shape
    tmx = _pick_div(n_pad, (1024, 512, 256, 128))
    blk = tmx * f_in * 4 + f_in * f_out * 4 + tmx * f_out * 4
    return pl.pallas_call(
        _xw_kernel,
        out_shape=jax.ShapeDtypeStruct((R, n_pad, f_out), jnp.float32),
        grid_spec=pltpu.PrefetchScalarGridSpec(
            num_scalar_prefetch=0,
            grid=(n_pad // tmx, R),
            in_specs=[
                pl.BlockSpec((tmx, f_in), lambda j, r: (j, 0)),       # X tile (resident across r)
                pl.BlockSpec((1, f_in, f_out), lambda j, r: (r, 0, 0)),  # W_r
            ],
            out_specs=pl.BlockSpec((1, tmx, f_out), lambda j, r: (r, j, 0)),
        ),
        compiler_params=pltpu.CompilerParams(
            dimension_semantics=("parallel", "arbitrary"),
            vmem_limit_bytes=_vmem_limit_bytes(blk, cap)),
    )(x, weight)


# ----------------------------------------------------------------------------
# Pallas kernel 2: relational aggregation  O[i] += A_r[i,k] @ XW_r[k]  (+bias, relu)
# Grid: (n_dst_tiles, R, n_src_tiles); output block is the resident accumulator.
# Used for the input layer (X = I  =>  XW_r = W_r directly, no eye(N)) and the
# hidden layer (XW from xw_transform).
# ----------------------------------------------------------------------------
def _rgcn_accum_kernel(a_ref, xw_ref, b_ref, o_ref, *, apply_relu):
    r = pl.program_id(1)
    k = pl.program_id(2)

    @pl.when(jnp.logical_and(r == 0, k == 0))
    def _():
        o_ref[...] = jnp.zeros_like(o_ref)

    xw = xw_ref[0]
    if a_ref.dtype != xw.dtype:          # optional bf16 adjacency path
        xw = xw.astype(a_ref.dtype)
    # (tm, tk) @ (tk, f_out) on the MXU, f32 accumulation into the resident block.
    o_ref[...] += jnp.dot(a_ref[0], xw, preferred_element_type=jnp.float32)

    @pl.when(jnp.logical_and(r == pl.num_programs(1) - 1,
                             k == pl.num_programs(2) - 1))
    def _():
        h = o_ref[...] + b_ref[...]
        if apply_relu:
            h = jnp.maximum(h, 0.0)
        o_ref[...] = h


def rgcn_accum_layer(adj, xw, bias2d, *, apply_relu, cap):
    """adj: (R, N_pad, N_pad), xw: (R, N_pad, f_out), bias2d: (1, f_out)."""
    R, n_pad, _ = adj.shape
    f_out = xw.shape[2]
    tm, tk = _pick_tiles(n_pad, cap)
    itemsize = jnp.dtype(adj.dtype).itemsize
    blk = tm * tk * itemsize + tk * f_out * 4 + tm * f_out * 4 + f_out * 4

    kernel = partial(_rgcn_accum_kernel, apply_relu=apply_relu)
    return pl.pallas_call(
        kernel,
        out_shape=jax.ShapeDtypeStruct((n_pad, f_out), jnp.float32),
        grid_spec=pltpu.PrefetchScalarGridSpec(
            num_scalar_prefetch=0,
            grid=(n_pad // tm, R, n_pad // tk),
            in_specs=[
                pl.BlockSpec((1, tm, tk), lambda i, r, k: (r, i, k)),      # A_r tile
                pl.BlockSpec((1, tk, f_out), lambda i, r, k: (r, k, 0)),   # XW_r src tile
                pl.BlockSpec((1, f_out), lambda i, r, k: (0, 0)),          # bias
            ],
            out_specs=pl.BlockSpec((tm, f_out), lambda i, r, k: (i, 0)),   # resident acc
        ),
        compiler_params=pltpu.CompilerParams(
            dimension_semantics=("parallel", "arbitrary", "arbitrary"),
            vmem_limit_bytes=_vmem_limit_bytes(blk, cap)),
    )(adj, xw, bias2d)


# ----------------------------------------------------------------------------
# Pallas kernel 3: final RelGraphConv layer with fused GlobalAttentionPooling.
# Same aggregation structure, but the per-dst-tile result is consumed directly
# by an online-softmax readout (VPU multiply + lane/sublane reductions; no MXU
# 1-lane matmuls, no XLU transpose) so the final (N, out) activations never
# round-trip HBM.  The dst axis must be sequential ("arbitrary") because the
# softmax state (m, l, pooled sum) persists across dst tiles.
# ----------------------------------------------------------------------------
def _rgcn_final_kernel(a_ref, xw_ref, b_ref, gw_ref, gb_ref, o_ref,
                       acc_ref, m_sc, l_sc, *, n_real, tm):
    i = pl.program_id(0)
    r = pl.program_id(1)
    k = pl.program_id(2)
    first_rk = jnp.logical_and(r == 0, k == 0)
    last_rk = jnp.logical_and(r == pl.num_programs(1) - 1,
                              k == pl.num_programs(2) - 1)

    @pl.when(jnp.logical_and(i == 0, first_rk))
    def _():
        m_sc[...] = jnp.full_like(m_sc, _NEG_BIG)
        l_sc[...] = jnp.zeros_like(l_sc)
        o_ref[...] = jnp.zeros_like(o_ref)

    @pl.when(first_rk)
    def _():
        acc_ref[...] = jnp.zeros_like(acc_ref)

    xw = xw_ref[0]
    if a_ref.dtype != xw.dtype:
        xw = xw.astype(a_ref.dtype)
    acc_ref[...] += jnp.dot(a_ref[0], xw, preferred_element_type=jnp.float32)

    @pl.when(last_rk)
    def _():
        h = acc_ref[...] + b_ref[...]                                   # (tm, op), no relu
        gate = jnp.sum(h * gw_ref[...], axis=-1, keepdims=True) + gb_ref[...]  # (tm, 1)
        row = jax.lax.broadcasted_iota(jnp.int32, (tm, 1), 0) + i * tm
        gate = jnp.where(row < n_real, gate, _NEG_BIG)                  # mask padded nodes
        m_new = jnp.maximum(m_sc[...], jnp.max(gate, axis=0, keepdims=True))
        alpha = jnp.exp(m_sc[...] - m_new)
        p = jnp.exp(gate - m_new)                                       # 0 on padded rows
        l_sc[...] = alpha * l_sc[...] + jnp.sum(p, axis=0, keepdims=True)
        o_ref[...] = alpha * o_ref[...] + jnp.sum(p * h, axis=0, keepdims=True)
        m_sc[...] = m_new

    @pl.when(jnp.logical_and(i == pl.num_programs(0) - 1, last_rk))
    def _():
        o_ref[...] = o_ref[...] / l_sc[...]


def rgcn_final_readout(adj, xw, bias2d, gate_w, gate_b, *, n_real, cap):
    """adj: (R, N_pad, N_pad), xw: (R, N_pad, op), gate_w: (1, op) -> (1, op)."""
    R, n_pad, _ = adj.shape
    f_out = xw.shape[2]
    tm, tk = _pick_tiles(n_pad, cap)
    itemsize = jnp.dtype(adj.dtype).itemsize
    blk = tm * tk * itemsize + tk * f_out * 4 + 2 * tm * f_out * 4 + 4 * f_out * 4

    kernel = partial(_rgcn_final_kernel, n_real=n_real, tm=tm)
    return pl.pallas_call(
        kernel,
        out_shape=jax.ShapeDtypeStruct((1, f_out), jnp.float32),
        grid_spec=pltpu.PrefetchScalarGridSpec(
            num_scalar_prefetch=0,
            grid=(n_pad // tm, R, n_pad // tk),
            in_specs=[
                pl.BlockSpec((1, tm, tk), lambda i, r, k: (r, i, k)),     # A_r tile
                pl.BlockSpec((1, tk, f_out), lambda i, r, k: (r, k, 0)),  # XW_r src tile
                pl.BlockSpec((1, f_out), lambda i, r, k: (0, 0)),         # bias
                pl.BlockSpec((1, f_out), lambda i, r, k: (0, 0)),         # gate weight row
                pl.BlockSpec((1, 1), lambda i, r, k: (0, 0)),             # gate bias
            ],
            out_specs=pl.BlockSpec((1, f_out), lambda i, r, k: (0, 0)),   # pooled (resident)
            scratch_shapes=[
                pltpu.VMEM((tm, f_out), jnp.float32),                     # per-tile h acc
                pltpu.VMEM((1, 1), jnp.float32),                          # running max
                pltpu.VMEM((1, 1), jnp.float32),                          # running denom
            ],
        ),
        compiler_params=pltpu.CompilerParams(
            dimension_semantics=("arbitrary", "arbitrary", "arbitrary"),
            vmem_limit_bytes=_vmem_limit_bytes(blk, cap)),
    )(adj, xw, bias2d, gate_w, gate_b)


# ----------------------------------------------------------------------------
# Full model forward (glue in plain JAX).  Node count and feature widths are
# zero-padded to 128 multiples internally (exact; lane-dense stores, bounded
# VMEM tiles on all generations) and sliced off at the end.
# ----------------------------------------------------------------------------
def rgcn_model_forward(adj_r, params, *, adj_dtype=jnp.float32):
    # NOTE: pass adj_dtype=jnp.bfloat16 to halve the HBM traffic of the
    # dominant R*N^2 adjacency stream at large N (f32 accumulation is kept);
    # f32 default keeps the small-size check exact.
    R, N, _ = adj_r.shape
    h_dim = params["w_in"].shape[2]
    out_dim = params["w_out"].shape[2]
    hp = _round_up(h_dim, _LANE)
    op = _round_up(out_dim, _LANE)
    n_pad = _round_up(max(N, _LANE), _LANE)
    cap = _vmem_capacity_bytes()

    adj = _pad_last2(adj_r, n_pad, n_pad).astype(adj_dtype)               # (R, n_pad, n_pad)

    # Layer 1: X = I (node-id one-hot) => XW_r == W_r; no eye(N), no identity matmul.
    w_in = _pad_last2(params["w_in"], n_pad, hp)                          # (R, n_pad, hp)
    b_in = _pad_last(params["b_in"].reshape(1, -1), hp)
    h = rgcn_accum_layer(adj, w_in, b_in, apply_relu=True, cap=cap)       # (n_pad, hp)

    # Hidden layer: hoisted per-relation transform, then adjacency aggregation.
    w_hid = _pad_last2(params["w_hid"], hp, hp)                           # (R, hp, hp)
    b_hid = _pad_last(params["b_hid"].reshape(1, -1), hp)
    xw1 = xw_transform(h, w_hid, cap=cap)                                 # (R, n_pad, hp)
    h = rgcn_accum_layer(adj, xw1, b_hid, apply_relu=True, cap=cap)       # (n_pad, hp)

    # Output layer + fused global attention pooling readout.
    w_out = _pad_last2(params["w_out"], hp, op)                           # (R, hp, op)
    b_out = _pad_last(params["b_out"].reshape(1, -1), op)
    xw2 = xw_transform(h, w_out, cap=cap)                                 # (R, n_pad, op)
    gw = _pad_last(params["gate_w"].reshape(1, -1), op)                   # (1, op)
    gb = params["gate_b"].reshape(1, 1)
    out_p = rgcn_final_readout(adj, xw2, b_out, gw, gb, n_real=N, cap=cap)  # (1, op)
    return out_p[:, :out_dim]


def rgcn_model_reference(adj_r, params):
    """Pure-JAX reference for correctness checking."""
    N = adj_r.shape[1]

    def layer(x, w, b, relu):
        xw = jnp.einsum("nf,rfo->rno", x, w)
        h = jnp.einsum("rvn,rno->vo", adj_r, xw) + b
        return jnp.maximum(h, 0.0) if relu else h

    h = layer(jnp.eye(N, dtype=jnp.float32), params["w_in"], params["b_in"], True)
    h = layer(h, params["w_hid"], params["b_hid"], True)
    h = layer(h, params["w_out"], params["b_out"], False)
    gate = h @ params["gate_w"] + params["gate_b"]
    a = jax.nn.softmax(gate, axis=0)
    return a.T @ h


if __name__ == "__main__":
    # Small, module-consistent sizes.
    num_nodes = 16
    h_dim = 32
    out_dim = 8
    num_relations = 4
    num_edges = 48

    key = jax.random.PRNGKey(0)
    ks = jax.random.split(key, 10)

    # --- Deterministic synthetic graph (single graph) ---------------------
    src = jax.random.randint(ks[0], (num_edges,), 0, num_nodes)
    dst = jax.random.randint(ks[1], (num_edges,), 0, num_nodes)
    rel = jax.random.randint(ks[2], (num_edges,), 0, num_relations)
    # DGL-style norm: 1 / in-degree(dst)
    in_deg = jnp.zeros((num_nodes,), jnp.float32).at[dst].add(1.0)
    norm = 1.0 / jnp.maximum(in_deg[dst], 1.0)
    # Dense normalized relational adjacency A[r, dst, src]
    adj_r = jnp.zeros((num_relations, num_nodes, num_nodes), jnp.float32)
    adj_r = adj_r.at[rel, dst, src].add(norm)

    # --- Deterministic parameters (basis regularizer, bases == relations) --
    def winit(k, shape, scale=0.1):
        return (scale * jax.random.normal(k, shape)).astype(jnp.float32)

    params = {
        "w_in":  winit(ks[3], (num_relations, num_nodes, h_dim)),
        "b_in":  jnp.zeros((h_dim,), jnp.float32),
        "w_hid": winit(ks[4], (num_relations, h_dim, h_dim)),
        "b_hid": jnp.zeros((h_dim,), jnp.float32),
        "w_out": winit(ks[5], (num_relations, h_dim, out_dim)),
        "b_out": jnp.zeros((out_dim,), jnp.float32),
        "gate_w": winit(ks[6], (out_dim, 1)),
        "gate_b": winit(ks[7], (1,)),
    }
    # TODO(synk): dropout is identity here (p=0.0 / eval mode), so it is omitted.

    out = rgcn_model_forward(adj_r, params)
    out = jax.block_until_ready(out)

    ref = rgcn_model_reference(adj_r, params)
    assert out.shape == (1, out_dim)
    assert jnp.allclose(out, ref, atol=1e-4, rtol=1e-4), "mismatch vs reference"

    print("KERNEL_OK")
</pallas_src>

<mosaic_0001>
module attributes {stable_mosaic.version = 11 : i64} {
  func.func @_rgcn_accum_kernel(%arg0: i32, %arg1: i32, %arg2: i32, %arg3: memref<1x64x128xf32, #tpu.memory_space<vmem>>, %arg4: memref<1x128x128xf32, #tpu.memory_space<vmem>>, %arg5: memref<1x128xf32, #tpu.memory_space<vmem>>, %arg6: memref<64x128xf32, #tpu.memory_space<vmem>>) attributes {dimension_semantics = [#tpu.dimension_semantics<parallel>, #tpu.dimension_semantics<arbitrary>, #tpu.dimension_semantics<arbitrary>], iteration_bounds = array<i64: 2, 4, 1>, scalar_prefetch = 0 : i64, scratch_operands = 0 : i64, tpu.core_type = #tpu.core_type<tc>, window_params = [{transform_indices = @transform_0, window_bounds = array<i64: 1, 64, 128>}, {transform_indices = @transform_1, window_bounds = array<i64: 1, 128, 128>}, {pipeline_mode = #tpu.pipeline_mode<synchronous>, transform_indices = @transform_2, window_bounds = array<i64: 1, 128>}, {transform_indices = @transform_3, window_bounds = array<i64: 64, 128>}]} {
    %c0_i32 = arith.constant 0 : i32
    %0 = arith.cmpi eq, %arg1, %c0_i32 : i32
    %c0_i32_0 = arith.constant 0 : i32
    %1 = arith.cmpi eq, %arg2, %c0_i32_0 : i32
    %2 = arith.andi %0, %1 : i1
    %3 = arith.extui %2 : i1 to i32
    %c0_i32_1 = arith.constant 0 : i32
    %4 = arith.cmpi ne, %3, %c0_i32_1 : i32
    scf.if %4 {
      %cst_13 = arith.constant 0.000000e+00 : f32
      %18 = vector.broadcast %cst_13 : f32 to vector<64x128xf32>
      %c0_14 = arith.constant 0 : index
      %c0_15 = arith.constant 0 : index
      %19 = vector.load %arg6[%c0_14, %c0_15] : memref<64x128xf32, #tpu.memory_space<vmem>>, vector<64x128xf32>
      tpu.vector_store %arg6[%c0_14, %c0_15], %18 {strides = array<i32>} : memref<64x128xf32, #tpu.memory_space<vmem>>, vector<64x128xf32>,
    } else {
    }
    %c0 = arith.constant 0 : index
    %c0_2 = arith.constant 0 : index
    %c0_3 = arith.constant 0 : index
    %5 = vector.load %arg4[%c0, %c0_2, %c0_3] : memref<1x128x128xf32, #tpu.memory_space<vmem>>, vector<1x128x128xf32>
    %6 = vector.shape_cast %5 : vector<1x128x128xf32> to vector<128x128xf32>
    %c0_4 = arith.constant 0 : index
    %c0_5 = arith.constant 0 : index
    %7 = vector.load %arg6[%c0_4, %c0_5] : memref<64x128xf32, #tpu.memory_space<vmem>>, vector<64x128xf32>
    %c0_6 = arith.constant 0 : index
    %c0_7 = arith.constant 0 : index
    %c0_8 = arith.constant 0 : index
    %8 = vector.load %arg3[%c0_6, %c0_7, %c0_8] : memref<1x64x128xf32, #tpu.memory_space<vmem>>, vector<1x64x128xf32>
    %9 = vector.shape_cast %8 : vector<1x64x128xf32> to vector<64x128xf32>
    %cst = arith.constant dense<0.000000e+00> : vector<64x128xf32>
    %10 = tpu.matmul %9, %6, %cst {dimension_numbers = #tpu.dot_dimension_numbers<[1], [0], [0], [1], [0, 0, 1, 1], [], []>} : vector<64x128xf32>, vector<128x128xf32>, vector<64x128xf32> -> vector<64x128xf32>
    %11 = arith.addf %7, %10 : vector<64x128xf32>
    %c0_9 = arith.constant 0 : index
    %c0_10 = arith.constant 0 : index
    %12 = vector.load %arg6[%c0_9, %c0_10] : memref<64x128xf32, #tpu.memory_space<vmem>>, vector<64x128xf32>
    tpu.vector_store %arg6[%c0_9, %c0_10], %11 {strides = array<i32>} : memref<64x128xf32, #tpu.memory_space<vmem>>, vector<64x128xf32>,
    %c3_i32 = arith.constant 3 : i32
    %13 = arith.cmpi eq, %arg1, %c3_i32 : i32
    %c0_i32_11 = arith.constant 0 : i32
    %14 = arith.cmpi eq, %arg2, %c0_i32_11 : i32
    %15 = arith.andi %13, %14 : i1
    %16 = arith.extui %15 : i1 to i32
    %c0_i32_12 = arith.constant 0 : i32
    %17 = arith.cmpi ne, %16, %c0_i32_12 : i32
    scf.if %17 {
      %c0_13 = arith.constant 0 : index
      %c0_14 = arith.constant 0 : index
      %18 = vector.load %arg6[%c0_13, %c0_14] : memref<64x128xf32, #tpu.memory_space<vmem>>, vector<64x128xf32>
      %c0_15 = arith.constant 0 : index
      %c0_16 = arith.constant 0 : index
      %19 = vector.load %arg5[%c0_15, %c0_16] : memref<1x128xf32, #tpu.memory_space<vmem>>, vector<1x128xf32>
      %20 = vector.broadcast %19 : vector<1x128xf32> to vector<64x128xf32>
      %21 = arith.addf %18, %20 : vector<64x128xf32>
      %cst_17 = arith.constant 0.000000e+00 : f32
      %22 = vector.broadcast %cst_17 : f32 to vector<64x128xf32>
      %23 = arith.maximumf %21, %22 : vector<64x128xf32>
      %c0_18 = arith.constant 0 : index
      %c0_19 = arith.constant 0 : index
      %24 = vector.load %arg6[%c0_18, %c0_19] : memref<64x128xf32, #tpu.memory_space<vmem>>, vector<64x128xf32>
      tpu.vector_store %arg6[%c0_18, %c0_19], %23 {strides = array<i32>} : memref<64x128xf32, #tpu.memory_space<vmem>>, vector<64x128xf32>,
    } else {
    }
    return
  }
  func.func @transform_0(%arg0: i32, %arg1: i32, %arg2: i32) -> (i32, i32, i32) {
    %c0_i32 = arith.constant 0 : i32
    return %arg1, %arg0, %arg2 : i32, i32, i32
  }
  func.func @transform_1(%arg0: i32, %arg1: i32, %arg2: i32) -> (i32, i32, i32) {
    %c0_i32 = arith.constant 0 : i32
    %c0_i32_0 = arith.constant 0 : i32
    return %arg1, %arg2, %c0_i32 : i32, i32, i32
  }
  func.func @transform_2(%arg0: i32, %arg1: i32, %arg2: i32) -> (i32, i32) {
    %c0_i32 = arith.constant 0 : i32
    %c0_i32_0 = arith.constant 0 : i32
    %c0_i32_1 = arith.constant 0 : i32
    return %c0_i32, %c0_i32_0 : i32, i32
  }
  func.func @transform_3(%arg0: i32, %arg1: i32, %arg2: i32) -> (i32, i32) {
    %c0_i32 = arith.constant 0 : i32
    %c0_i32_0 = arith.constant 0 : i32
    return %arg0, %c0_i32 : i32, i32
  }
}

</mosaic_0001>

<bundles_post_ra>
// kernel: tpu_custom_call.1
= control target key start
LH: loop header
LB: loop body
LE: loop exit
PB: predicated region body
PF: predicated region fallthrough
CT: control target
= control target key end

     0   :  { %s1319_s0 = inlined_call_operand.hbm [shape: f32[4,128,128], index: 0, kind: input, shape index: {}]   ;;  %s1320_s1 = inlined_call_operand.hbm [shape: f32[4,128,128], index: 1, kind: input, shape index: {}]   ;;  %s1321_s2 = inlined_call_operand.vmem [shape: f32[1,128], index: 2, kind: input, shape index: {}]   ;;  %s1322_s3 = inlined_call_operand.hbm [shape: f32[128,128], index: 3, kind: output, shape index: {}]  }
   0x1   :  { %1331 = sst [smem:[#allocation20_spill]] %s1319_s0 }
   0x2   :  { %1332 = sst [smem:[#allocation21_spill]] %s1322_s3 }
   0x3   :  { %8 = vsyncpa [#allocation3], 0 }
   0x4   :  { %10 = vsyncpa [#allocation3 + $0x1], 0 }
   0x5   :  { %11 = vsyncpa [#allocation6], 0 }
   0x6   :  { %13 = vsyncpa [#allocation6 + $0x1], 0 }
   0x7   :  { %14 = vsyncpa [#allocation4], 0 }
   0x8   :  { %16 = vsyncpa [#allocation4 + $0x1], 0  ;;  %s991_s12 = smov 0   ;;  %s993_s13 = smov 0  }
   0x9   :  { %s995_s14 = smov 0   ;;  %s997_s15 = smov 0  }
   0xa   :  { %s999_s16 = smov 0   ;;  %s1001_s17 = smov 0  }
   0xb   :  { %s1003_s18 = smov 0   ;;  %s1005_s19 = smov 0  }
   0xc   :  { %s1007_s20 = smov 0   ;;  %s1009_s21 = smov 0  }
   0xd   :  { %s1011_s22 = smov 0   ;;  %s1013_s23 = smov 0  }
   0xe   :  { %s1015_s24 = smov 0   ;;  %s1017_s25 = smov 0  }
   0xf LB: > { %1333 = sst [smem:[#allocation11_spill]] %s920_s14  ;;  %s543_s26 = sadd.s32 4294967295, %s964_s25   ;;  %s964_s25 = sphi %s1017_s25, %s22_s25   ;;  %s960_s24 = sphi %s1015_s24, %s1362_s24   ;;  %s956_s23 = sphi %s1013_s23, %s1361_s23   ;;  %s952_s22 = sphi %s1011_s22, %s1360_s22   ;;  %s948_s21 = sphi %s1009_s21, %s1370_s21   ;;  %s944_s20 = sphi %s1007_s20, %s1358_s20   ;;  %s940_s19 = sphi %s1005_s19, %s1369_s19   ;;  %s936_s18 = sphi %s1003_s18, %s1368_s18   ;;  %s932_s17 = sphi %s1001_s17, %s1367_s17   ;;  %s928_s16 = sphi %s999_s16, %s1366_s16   ;;  %s924_s15 = sphi %s997_s15, %s1365_s15   ;;  %s920_s14 = sphi %s995_s14, %s1355_s14   ;;  %s916_s13 = sphi %s993_s13, %s1364_s13   ;;  %s912_s12 = sphi %s991_s12, %s1363_s12  }
  0x10   : > { %1334 = sst [smem:[#allocation12_spill]] %s944_s20  ;;  %s544_s27 = sadd.s32 4294967294, %s964_s25  }
  0x11   : > { %1335 = sst [smem:[#allocation13_spill]] %s956_s23  ;;  %s37_s28 = sadd.s32 1, %s956_s23 }
  0x12   : > { %1336 = sst [smem:[#allocation14_spill]] %s960_s24  ;;  %s41_s29 = sadd.s32 1, %s960_s24 }
  0x13   : > { %p39_p0 = scmp.ge.s32.totalorder %s37_s28, 4  ;;  %s52_s30 = sadd.s32 1, %s944_s20 }
  0x14   : > { %p59_p1 = scmp.ne.s32.totalorder %s944_s20, %s940_s19  ;;  %p60_p2 = scmp.eq.s32.totalorder %s964_s25, 0 }
  0x15   : > { %s1372_s28 = smov (%p39_p0, %s37_s28), 0  ;;  %s1374_s29 = smov (!%p39_p0, %s41_s29), %s960_s24 }
  0x16   : > { %1337 = sst [smem:[#allocation15_spill]] %s1372_s28  ;;  %s1072_s4 = ssub.s32 %s956_s23, %s1372_s28 }
  0x17   : > { %p1076_p3 = por %p60_p2, %p59_p1  ;;  %p43_p4 = scmp.ge.s32.totalorder %s1374_s29, 2 }
  0x18   : > { %p65_p5 = scmp.ne.s32.totalorder %s940_s19, %s936_s18  ;;  %p1081_p6 = scmp.eq.s32.totalorder %s543_s26, 0 }
  0x19   : > { %p78_p7 = scmp.eq.s32.totalorder %s1072_s4, 0  ;;  %s1376_s29 = smov (%p43_p4, %s1374_s29), 0 }
  0x1a   : > { %1340 = sst [smem:[#allocation16_spill]] %s1376_s29  ;;  %p1090_p8 = por %p1081_p6, %p65_p5 }
  0x1b   : > { %s127_s8 = sadd.s32 1, %s920_s14  ;;  %s46_s9 = ssub.s32 %s960_s24, %s1376_s29 }
  0x1c   : > { %p137_p9 = scmp.ne.s32.totalorder %s920_s14, %s916_s13  ;;  %s47_s10 = sor.u32 %s46_s9, %s1072_s4 }
  0x1d   : > { %p125_p10 = scmp.eq.s32.totalorder %s46_s9, 0  ;;  %p50_p11 = scmp.eq.s32.totalorder %s47_s10, 0 }
  0x1e   : > { %p138_p12 = scmp.eq.s32.totalorder %s543_s26, 7  ;;  %p143_p0 = scmp.ne.s32.totalorder %s916_s13, %s912_s12 }
  0x1f   : > { %s1101_s11 = scalar_select %p125_p10, %s920_s14, %s127_s8  }
  0x20   : > { %s1104_s18 = scalar_select %p50_p11, %s944_s20, %s52_s30  }
  0x21   : > { %1342 = sst [smem:[#allocation17_spill]] %s1101_s11  ;;  %p1106_p13 = por %p138_p12, %p137_p9 }
  0x22   : > { %1343 = sst [smem:[#allocation18_spill]] %s1104_s18  ;;  %p144_p1 = scmp.eq.s32.totalorder %s544_s27, 7 }
  0x23   : > { %p1328_p4 = scmp.lt.s32.totalorder %s964_s25, 8  ;;  %s167_s29 = sand.u32 1, %s944_s20  }
  0x24   : > { %p1114_p5 = por %p144_p1, %p143_p0  ;;  %s547_s26 = sshll.u32 %s167_s29, 6 }
  0x25   : > { %s548_s8 = sshll.u32 %s960_s24, 3  ;;  %s549_s30 = sshll.u32 %s956_s23, 4 }
  0x26   : > { %s177_s9 = sadd.s32 %s549_s30, %s548_s8  ;;  %s171_s10 = scalar_lea.vmem [#allocation2], %s547_s26 }
  0x27   : > { %s182_s18 = sshll.u32 %s171_s10, 4  ;;  %s550_s27 = sshll.u32 %s177_s9, 3  ;;  %s183_s18 = int_to_ptr.vmem [resolvable:$true] %s182_s18 }
  0x28   : > { %s1346_s0 = sld [smem:[#allocation20_spill]]  ;;  %p624_p9 = pnand %p1328_p4, %p1076_p3 }
  0x29   : > { %p554_p10 = scmp.ge.s32.totalorder %s964_s25, 1  ;;  %s168_s8 = scalar_lea.sflag [#allocation3], %s167_s29 }
  0x2a   : > { %s966_s30 = smov 128   ;;  %s967_s9 = smov 8  }
  0x2b   : > { %p214_p11 = scmp.lt.s32.totalorder %s964_s25, 9  ;;  %s80_s20 = sadd.s32 1, %s932_s17 }
  0x2c   : > { %p87_p0 = scmp.ne.s32.totalorder %s932_s17, %s928_s16  ;;  %p93_p1 = scmp.ne.s32.totalorder %s928_s16, %s924_s15 }
  0x2d   : > { %p1129_p12 = pnand %p554_p10, %p214_p11  ;;  %s565_s11 = sshll.u32 %s956_s23, 7 }
  0x2e   : > { %s179_s14 = scalar_lea.hbm %s1346_s0, %s550_s27  ;;  %p89_p3 = por %p87_p0, %p60_p2 }
  0x2f   : > { %s180_s26 = sshll.u32 %s179_s14, 4  ;;  %s192_s14 = sand.u32 1, %s932_s17   ;;  %s181_s26 = int_to_ptr.hbm [resolvable:$true] %s180_s26 }
  0x30   : > { %626 = dma.hbm_to_vmem [thread:$0]  (!%p624_p9), %s181_s26, 1024, %s183_s18, %s168_s8, %s966_s30, %s966_s30, %s967_s9  }
  0x31   : > { %s1139_s5 = scalar_select %p78_p7, %s932_s17, %s80_s20  }
  0x32   : > { %p1149_p4 = por %p93_p1, %p1081_p6  ;;  %s551_s18 = sshll.u32 %s192_s14, 7 }
  0x33   : > { %1348 = sst [smem:[#allocation19_spill]] %s1139_s5  ;;  %s203_s8 = scalar_lea.hbm %s1320_s1, %s565_s11 }
  0x34   : > { %s204_s0 = sshll.u32 %s203_s8, 4  ;;  %s196_s4 = scalar_lea.vmem [#allocation5], %s551_s18  ;;  %s205_s0 = int_to_ptr.hbm [resolvable:$true] %s204_s0 }
  0x35   : > { %s206_s20 = sshll.u32 %s196_s4, 4  ;;  %p1350_p7 = scmp.lt.s32.totalorder %s964_s25, 8  ;;  %s207_s20 = int_to_ptr.vmem [resolvable:$true] %s206_s20 }
  0x36   : > { %s193_s15 = scalar_lea.sflag [#allocation6], %s192_s14  ;;  %218 = sbr.rel (%p1129_p12) target bundleno = 284 (0x11c), region = 32 }
  0x37   : > { %p627_p2 = pnand %p1350_p7, %p89_p3  ;;  %s220_s6 = sand.u32 (!%p1129_p12), 1, %s940_s19  }
  0x38   : > { %s555_s24 = sshll.u32 (!%p1129_p12), %s220_s6, 6  ;;  %s221_s23 = scalar_lea.sflag (!%p1129_p12), [#allocation3], %s220_s6 }
  0x39   : > { %629 = dma.hbm_to_vmem [thread:$0]  (!%p627_p2), %s205_s0, 2048, %s207_s20, %s193_s15, %s966_s30, %s966_s30, %s967_s9  }
  0x3a   : > { %s1161_s5 = scalar_lea.vmem (!%p1129_p12), [#allocation2], %s555_s24 }
  0x3b   : > { %899 = dma.done.wait (%p1090_p8), %s221_s23, 1024  }
  0x3c   : > { %901 = vsyncadd (%p1090_p8), %s221_s23, 4294966272  ;;  %s230_s11 = sand.u32 1, %s928_s16  }
  0x3d   : > { %s556_s14 = sshll.u32 %s230_s11, 7  ;;  %s231_s0 = scalar_lea.sflag [#allocation6], %s230_s11 }
  0x3e   : > { %s1168_s30 = scalar_lea.vmem [#allocation5], %s556_s14 }
  0x3f   : > { %903 = dma.done.wait (%p1149_p4), %s231_s0, 2048  }
  0x40   : > { %905 = vsyncadd (%p1149_p4), %s231_s0, 4294965248  ;;  %s260_s24 = sand.u32 1, %s916_s13   ;;  %p266_p6 = scmp.eq.s32.totalorder %s948_s21, 0 }
  0x41   : > { %s557_s7 = sshll.u32 %s260_s24, 6  ;;  %v968_v0 = vmov (%p266_p6), 0.0  }
  0x42   : > { %s1178_s23 = scalar_lea.vmem [#allocation7], %s557_s7  ;;  %271 = sbr.rel (!%p266_p6) target bundleno = 75 (0x4b), region = 44 }
  0x43   : > { %272 = vst [vmem:[%s1178_s23] sm:$0xff] (%p266_p6), %v968_v0 }
  0x44   : > { %273 = vst [vmem:[%s1178_s23 + $0x8] sm:$0xff] (%p266_p6), %v968_v0 }
  0x45   : > { %274 = vst [vmem:[%s1178_s23 + $0x10] sm:$0xff] (%p266_p6), %v968_v0 }
  0x46   : > { %275 = vst [vmem:[%s1178_s23 + $0x18] sm:$0xff] (%p266_p6), %v968_v0 }
  0x47   : > { %276 = vst [vmem:[%s1178_s23 + $0x20] sm:$0xff] %v968_v0 }
  0x48   : > { %277 = vst [vmem:[%s1178_s23 + $0x28] sm:$0xff] %v968_v0 }
  0x49   : > { %278 = vst [vmem:[%s1178_s23 + $0x30] sm:$0xff] %v968_v0 }
  0x4a   : > { %279 = vst [vmem:[%s1178_s23 + $0x38] sm:$0xff] %v968_v0 }
  0x4b PF: > { %v295_v1 = vld [vmem:[%s1168_s30 + $0x78] sm:$0xff]  ;;  %v294_v2 = vld [vmem:[%s1168_s30 + $0x70] sm:$0xff]  ;;  %v293_v3 = vld [vmem:[%s1168_s30 + $0x68] sm:$0xff]  ;;  %p369_p8 = scmp.eq.s32.totalorder %s948_s21, 3 }
  0x4c   : > { %570 = vmatpush.msra.mxu2 %v295_v1  ;;  %571 = vmatpush.msra.mxu3 %v295_v1  ;;  %v292_v4 = vld [vmem:[%s1168_s30 + $0x60] sm:$0xff]  ;;  %v291_v5 = vld [vmem:[%s1168_s30 + $0x58] sm:$0xff]  ;;  %v290_v6 = vld [vmem:[%s1168_s30 + $0x50] sm:$0xff] }
  0x4d   : > { %312 = vmatpush.msra.mxu0 %v295_v1  ;;  %569 = vmatpush.msra.mxu1 %v295_v1  ;;  %v289_v7 = vld [vmem:[%s1168_s30 + $0x48] sm:$0xff]  ;;  %v288_v8 = vld [vmem:[%s1168_s30 + $0x40] sm:$0xff]  ;;  %v287_v9 = vld [vmem:[%s1168_s30 + $0x38] sm:$0xff] }
  0x4e   : > { %573 = vmatpush.msra.mxu2 %v294_v2  ;;  %574 = vmatpush.msra.mxu3 %v294_v2  ;;  %v286_v10 = vld [vmem:[%s1168_s30 + $0x30] sm:$0xff]  ;;  %v285_v11 = vld [vmem:[%s1168_s30 + $0x28] sm:$0xff]  ;;  %v284_v12 = vld [vmem:[%s1168_s30 + $0x20] sm:$0xff] }
  0x4f   : > { %313 = vmatpush.msra.mxu0 %v294_v2  ;;  %572 = vmatpush.msra.mxu1 %v294_v2  ;;  %v283_v13 = vld [vmem:[%s1168_s30 + $0x18] sm:$0xff]  ;;  %v282_v14 = vld [vmem:[%s1168_s30 + $0x10] sm:$0xff]  ;;  %v281_v15 = vld [vmem:[%s1168_s30 + $0x8] sm:$0xff] }
  0x50   : > { %576 = vmatpush.msra.mxu2 %v293_v3  ;;  %577 = vmatpush.msra.mxu3 %v293_v3  ;;  %v280_v16 = vld [vmem:[%s1168_s30] sm:$0xff]  ;;  %v310_v18 = vld [vmem:[%s1161_s5 + $0x30] sm:$0xff]  ;;  %v309_v21 = vld [vmem:[%s1161_s5 + $0x28] sm:$0xff] }
  0x51   : > { %314 = vmatpush.msra.mxu0 %v293_v3  ;;  %575 = vmatpush.msra.mxu1 %v293_v3  ;;  %v308_v17 = vld [vmem:[%s1161_s5 + $0x20] sm:$0xff]  ;;  %v306_v20 = vld [vmem:[%s1161_s5 + $0x10] sm:$0xff]  ;;  %v311_v22 = vld [vmem:[%s1161_s5 + $0x38] sm:$0xff] }
  0x52   : > { %579 = vmatpush.msra.mxu2 %v292_v4  ;;  %580 = vmatpush.msra.mxu3 %v292_v4  ;;  %v304_v19 = vld [vmem:[%s1161_s5] sm:$0xff]  ;;  %v305_v23 = vld [vmem:[%s1161_s5 + $0x8] sm:$0xff]  ;;  %v307_v24 = vld [vmem:[%s1161_s5 + $0x18] sm:$0xff] }
  0x53   : > { %315 = vmatpush.msra.mxu0 %v292_v4  ;;  %578 = vmatpush.msra.mxu1 %v292_v4  ;;  %v296_v25 = vld [vmem:[%s1178_s23] sm:$0xff]  ;;  %v298_v26 = vld [vmem:[%s1178_s23 + $0x10] sm:$0xff]  ;;  %v297_v37 = vld [vmem:[%s1178_s23 + $0x8] sm:$0xff] }
  0x54   : > { %582 = vmatpush.msra.mxu2 %v291_v5  ;;  %583 = vmatpush.msra.mxu3 %v291_v5  ;;  %v300_v31 = vld [vmem:[%s1178_s23 + $0x20] sm:$0xff]  ;;  %v302_v32 = vld [vmem:[%s1178_s23 + $0x30] sm:$0xff]  ;;  %v299_v38 = vld [vmem:[%s1178_s23 + $0x18] sm:$0xff] }
  0x55   : > { %316 = vmatpush.msra.mxu0 %v291_v5  ;;  %581 = vmatpush.msra.mxu1 %v291_v5  ;;  %v301_v43 = vld [vmem:[%s1178_s23 + $0x28] sm:$0xff]  ;;  %v303_v44 = vld [vmem:[%s1178_s23 + $0x38] sm:$0xff]  ;;  %v753_v50 = vld [vmem:[%s1321_s2] ss:$0 sm:$0xff] (%p369_p8) }
  0x56   : > { %585 = vmatpush.msra.mxu2 %v290_v6  ;;  %586 = vmatpush.msra.mxu3 %v290_v6 }
  0x57   : > { %317 = vmatpush.msra.mxu0 %v290_v6  ;;  %584 = vmatpush.msra.mxu1 %v290_v6 }
  0x58   : > { %588 = vmatpush.msra.mxu2 %v289_v7  ;;  %589 = vmatpush.msra.mxu3 %v289_v7 }
  0x59   : > { %318 = vmatpush.msra.mxu0 %v289_v7  ;;  %587 = vmatpush.msra.mxu1 %v289_v7 }
  0x5a   : > { %591 = vmatpush.msra.mxu2 %v288_v8  ;;  %592 = vmatpush.msra.mxu3 %v288_v8 }
  0x5b   : > { %319 = vmatpush.msra.mxu0 %v288_v8  ;;  %590 = vmatpush.msra.mxu1 %v288_v8 }
  0x5c   : > { %594 = vmatpush.msra.mxu2 %v287_v9  ;;  %595 = vmatpush.msra.mxu3 %v287_v9 }
  0x5d   : > { %320 = vmatpush.msra.mxu0 %v287_v9  ;;  %593 = vmatpush.msra.mxu1 %v287_v9 }
  0x5e   : > { %597 = vmatpush.msra.mxu2 %v286_v10  ;;  %598 = vmatpush.msra.mxu3 %v286_v10 }
  0x5f   : > { %321 = vmatpush.msra.mxu0 %v286_v10  ;;  %596 = vmatpush.msra.mxu1 %v286_v10 }
  0x60   : > { %600 = vmatpush.msra.mxu2 %v285_v11  ;;  %601 = vmatpush.msra.mxu3 %v285_v11 }
  0x61   : > { %322 = vmatpush.msra.mxu0 %v285_v11  ;;  %599 = vmatpush.msra.mxu1 %v285_v11 }
  0x62   : > { %603 = vmatpush.msra.mxu2 %v284_v12  ;;  %604 = vmatpush.msra.mxu3 %v284_v12 }
  0x63   : > { %323 = vmatpush.msra.mxu0 %v284_v12  ;;  %602 = vmatpush.msra.mxu1 %v284_v12 }
  0x64   : > { %606 = vmatpush.msra.mxu2 %v283_v13  ;;  %607 = vmatpush.msra.mxu3 %v283_v13 }
  0x65   : > { %324 = vmatpush.msra.mxu0 %v283_v13  ;;  %605 = vmatpush.msra.mxu1 %v283_v13 }
  0x66   : > { %609 = vmatpush.msra.mxu2 %v282_v14  ;;  %610 = vmatpush.msra.mxu3 %v282_v14 }
  0x67   : > { %325 = vmatpush.msra.mxu0 %v282_v14  ;;  %608 = vmatpush.msra.mxu1 %v282_v14 }
  0x68   : > { %612 = vmatpush.msra.mxu2 %v281_v15  ;;  %613 = vmatpush.msra.mxu3 %v281_v15 }
  0x69   : > { %326 = vmatpush.msra.mxu0 %v281_v15  ;;  %611 = vmatpush.msra.mxu1 %v281_v15 }
  0x6a   : > { %615 = vmatpush.msra.mxu2 %v280_v16  ;;  %616 = vmatpush.msra.mxu3 %v280_v16 }
  0x6b   : > { %340 = vmatmul.f32.vlgmr.msra.gmra.mxu2 %v308_v17  ;;  %346 = vmatmul.f32.vlgmr.msra.gmra.mxu3 %v310_v18 }
  0x6c   : > { %327 = vmatpush.msra.mxu0 %v280_v16  ;;  %614 = vmatpush.msra.mxu1 %v280_v16 }
  0x6d   : > { %328 = vmatmul.f32.vlgmr.msra.gmra.mxu0 %v304_v19  ;;  %334 = vmatmul.f32.vlgmr.msra.gmra.mxu1 %v306_v20 }
  0x73   : > { %343 = vmatmul.f32.gmra.mxu2 %v309_v21  ;;  %349 = vmatmul.f32.gmra.mxu3 %v311_v22 }
  0x75   : > { %331 = vmatmul.f32.gmra.mxu0 %v305_v23  ;;  %337 = vmatmul.f32.gmra.mxu1 %v307_v24 }
  0xea   : > { %v329_v27 = vpop.f32.mrf.mxu0  ;;  %v335_v28 = vpop.f32.mrf.mxu1 }
  0xeb   : > { %v353_v29 = vadd.f32 %v329_v27, %v296_v25  ;;  %v355_v30 = vadd.f32 %v335_v28, %v298_v26 }
  0xed   : > { %361 = vst [vmem:[%s1178_s23] sm:$0xff] %v353_v29 }
  0xee   : > { %363 = vst [vmem:[%s1178_s23 + $0x10] sm:$0xff] %v355_v30  ;;  %v341_v33 = vpop.f32.mrf.mxu2  ;;  %v347_v34 = vpop.f32.mrf.mxu3 }
  0xef   : > { %v357_v35 = vadd.f32 %v341_v33, %v300_v31  ;;  %v359_v36 = vadd.f32 %v347_v34, %v302_v32 }
  0xf1   : > { %365 = vst [vmem:[%s1178_s23 + $0x20] sm:$0xff] %v357_v35 }
  0xf2   : > { %367 = vst [vmem:[%s1178_s23 + $0x30] sm:$0xff] %v359_v36  ;;  %v332_v39 = vpop.f32.mrf.mxu0  ;;  %v338_v40 = vpop.f32.mrf.mxu1 }
  0xf3   : > { %v354_v41 = vadd.f32 %v332_v39, %v297_v37  ;;  %v356_v42 = vadd.f32 %v338_v40, %v299_v38 }
  0xf4   : > { %v374_v49 = vld [vmem:[%s1178_s23] sm:$0xff] (%p369_p8) }
  0xf5   : > { %362 = vst [vmem:[%s1178_s23 + $0x8] sm:$0xff] %v354_v41  ;;  %v376_v52 = vld [vmem:[%s1178_s23 + $0x10] sm:$0xff] (%p369_p8)  ;;  %v386_v54 = vadd.f32 (%p369_p8), %v753_v50, %v374_v49 }
  0xf6   : > { %364 = vst [vmem:[%s1178_s23 + $0x18] sm:$0xff] %v356_v42  ;;  %v344_v45 = vpop.f32.mrf.mxu2  ;;  %v350_v46 = vpop.f32.mrf.mxu3  ;;  %373 = sbr.rel (!%p369_p8) target bundleno = 263 (0x107), region = 48  ;;  %v388_v56 = vadd.f32 (%p369_p8), %v753_v50, %v376_v52 }
  0xf7   : > { %v358_v47 = vadd.f32 %v344_v45, %v301_v43  ;;  %v360_v48 = vadd.f32 %v350_v46, %v303_v44  ;;  %v394_v0 = vmax.f32 (%p369_p8), %v386_v54, 0.0 }
  0xf8   : > { %v378_v58 = vld [vmem:[%s1178_s23 + $0x20] sm:$0xff] (%p369_p8)  ;;  %v396_v2 = vmax.f32 (%p369_p8), %v388_v56, 0.0 }
  0xf9   : > { %366 = vst [vmem:[%s1178_s23 + $0x28] sm:$0xff] %v358_v47  ;;  %v380_v60 = vld [vmem:[%s1178_s23 + $0x30] sm:$0xff] (%p369_p8)  ;;  %v390_v61 = vadd.f32 (%p369_p8), %v753_v50, %v378_v58 }
  0xfa   : > { %368 = vst [vmem:[%s1178_s23 + $0x38] sm:$0xff] %v360_v48  ;;  %v392_v3 = vadd.f32 (%p369_p8), %v753_v50, %v380_v60 }
  0xfb   : > { %402 = vst [vmem:[%s1178_s23] sm:$0xff] %v394_v0  ;;  %v398_v6 = vmax.f32 %v390_v61, 0.0 }
  0xfc   : > { %v375_v51 = vld [vmem:[%s1178_s23 + $0x8] sm:$0xff]  ;;  %404 = vst [vmem:[%s1178_s23 + $0x10] sm:$0xff] %v396_v2  ;;  %v400_v8 = vmax.f32 %v392_v3, 0.0 }
  0xfd   : > { %v377_v53 = vld [vmem:[%s1178_s23 + $0x18] sm:$0xff]  ;;  %v387_v55 = vadd.f32 %v753_v50, %v375_v51  ;;  %406 = vst [vmem:[%s1178_s23 + $0x20] sm:$0xff] %v398_v6 }
  0xfe   : > { %v389_v57 = vadd.f32 %v753_v50, %v377_v53  ;;  %408 = vst [vmem:[%s1178_s23 + $0x30] sm:$0xff] %v400_v8 }
  0xff   : > { %v395_v1 = vmax.f32 %v387_v55, 0.0 }
 0x100   : > { %v379_v59 = vld [vmem:[%s1178_s23 + $0x28] sm:$0xff]  ;;  %v397_v4 = vmax.f32 %v389_v57, 0.0 }
 0x101   : > { %v391_v62 = vadd.f32 %v753_v50, %v379_v59  ;;  %v381_v63 = vld [vmem:[%s1178_s23 + $0x38] sm:$0xff]  ;;  %403 = vst [vmem:[%s1178_s23 + $0x8] sm:$0xff] %v395_v1 }
 0x102   : > { %v393_v5 = vadd.f32 %v753_v50, %v381_v63  ;;  %405 = vst [vmem:[%s1178_s23 + $0x18] sm:$0xff] %v397_v4 }
 0x103   : > { %v399_v7 = vmax.f32 %v391_v62, 0.0 }
 0x104   : > { %v401_v9 = vmax.f32 %v393_v5, 0.0 }
 0x105   : > { %407 = vst [vmem:[%s1178_s23 + $0x28] sm:$0xff] %v399_v7 }
 0x106   : > { %409 = vst [vmem:[%s1178_s23 + $0x38] sm:$0xff] %v401_v9 }
 0x107 PF: > { %s568_s21 = sshll.u32 %s952_s22, 6  ;;  %s1351_s18 = sld [smem:[#allocation21_spill]] }
 0x108   : > { %s423_s8 = sshll.u32 %s1178_s23, 4  ;;  %s411_s20 = scalar_lea.sflag [#allocation4], %s260_s24  ;;  %s424_s8 = int_to_ptr.vmem [resolvable:$true] %s423_s8 }
 0x10d   : > { %s1352_s27 = smov %s1351_s18  ;;  %s422_s26 = scalar_lea.hbm %s1351_s18, %s568_s21 }
 0x10e   : > { %s425_s4 = sshll.u32 %s422_s26, 4  ;;  %s834_s22 = scalar_lea.hbm %s1352_s27, 128  ;;  %s426_s4 = int_to_ptr.hbm [resolvable:$true] %s425_s4 }
 0x10f   : > { %s828_s15 = sshra.s32 %s426_s4, 4  ;;  %s829_s15 = int_to_ptr.hbm [resolvable:$true] %s828_s15 }
 0x110   : > { %s830_s6 = scalar_lea.hbm %s829_s15, 64  ;;  %p835_p11 = scmp.lt.s32.totalorder %s829_s15, %s1352_s27 }
 0x111   : > { %p831_p4 = scmp.ne.s32.totalorder %s829_s15, %s830_s6  ;;  %p836_p12 = scmp.lt.s32.totalorder %s834_s22, %s830_s6 }
 0x113   : > { %p832_p9 = pnand %p831_p4, %p1106_p13  ;;  %p837_p0 = por %p836_p12, %p835_p11 }
 0x115   : > { %p833_p10 = pneg %p832_p9 }
 0x117   : > { %p838_p3 = pnand %p837_p0, %p833_p10 }
 0x119   : > { %841 = shalt.err (!%p838_p3)
}
 0x11a   : > { %s969_s24 = smov 128   ;;  %s970_s7 = smov 8  }
 0x11b   : > { %621 = dma.vmem_to_hbm [thread:$0]  (%p1106_p13), %s424_s8, 1024, %s426_s4, %s411_s20, %s969_s24, %s969_s24, %s970_s7  }
 0x11c PF: > { %p635_p1 = scmp.ge.s32.totalorder %s964_s25, 2  ;;  %s440_s23 = sand.u32 1, %s912_s12  }
 0x11d   : > { %s441_s9 = scalar_lea.sflag [#allocation4], %s440_s23 }
 0x11e   : > { %p631_p7 = pnand %p635_p1, %p1114_p5 }
 0x120   : > { %p632_p2 = pneg %p631_p7 }
 0x122   : > { %907 = dma.done.wait (%p632_p2), %s441_s9, 1024  }
 0x123   : > { %909 = vsyncadd (%p632_p2), %s441_s9, 4294966272  ;;  %s22_s25 = sadd.s32 1, %s964_s25   ;;  %s1354_s28 = sld [smem:[#allocation11_spill]] }
 0x124   : > { %p1272_p6 = scmp.ge.s32.totalorder %s22_s25, 10   ;;  %s1355_s14 = sld [smem:[#allocation17_spill]] }
 0x125   : > { %s1356_s21 = sld [smem:[#allocation19_spill]]  ;;  %s1363_s12 = smov %s916_s13 }
 0x126   : > { %s1357_s5 = sld [smem:[#allocation12_spill]]  ;;  %s1365_s15 = smov %s928_s16 }
 0x127   : > { %s1358_s20 = sld [smem:[#allocation18_spill]]  ;;  %s1366_s16 = smov %s932_s17 }
 0x128   : > { %s1359_s3 = sld [smem:[#allocation13_spill]]  ;;  %s1368_s18 = smov %s940_s19 }
 0x129   : > { %s1360_s22 = sld [smem:[#allocation14_spill]]  ;;  %s1364_s13 = smov %s1354_s28 }
 0x12a   : > { %s1361_s23 = sld [smem:[#allocation15_spill]]  ;;  %21 = sbr.rel (!%p1272_p6) target bundleno = 15 (0xf), region = 98 }
 0x12b   : > { %s1362_s24 = sld [smem:[#allocation16_spill]]  ;;  %s1367_s17 = smov %s1356_s21 }
 0x12c   : > { %s1369_s19 = smov %s1357_s5 }
 0x12e   : > { %s1370_s21 = smov %s1359_s3 }
 0x12f   :  { %447 = vsyncpa [#allocation3], 1 }
 0x130   :  { %449 = vsyncpa [#allocation3 + $0x1], 1 }
 0x131   :  { %450 = vsyncpa [#allocation6], 1 }
 0x132   :  { %452 = vsyncpa [#allocation6 + $0x1], 1 }
 0x133   :  { %453 = vsyncpa [#allocation4], 1 }
 0x134   :  { %455 = vsyncpa [#allocation4 + $0x1], 1 }

</bundles_post_ra>
